<compile_context>
chip_gen: v5e
topology: v5e:2x2
jax: 0.10.0
libtpu: 0.0.40
codegen_flags: <defaults>
</compile_context>

<pallas_src>
import jax
import jax.numpy as jnp
from jax.experimental import pallas as pl
from jax.experimental.pallas import tpu as pltpu

LANE = 128
BF16_SUBLANE = 16  # bf16 packs 16 rows per vreg


def _round_up(x, m):
    return ((x + m - 1) // m) * m


# ----------------------------- kernel ---------------------------------------


def classifier_kernel(s_ref, x_ref, w1_ref, b1_ref, w2_ref, b2_ref, o_ref):
    # s_ref: (2,) f32 in SMEM -> per-layer weight_norm(dim=None) scale g / ||v||_F.
    s1 = s_ref[0]
    s2 = s_ref[1]

    # Cast activations to bf16 in-kernel (no wrapper-side pad/cast HBM pass).
    x = x_ref[...].astype(jnp.bfloat16)

    # h = relu((x @ v1^T) * s1 + b1)  -- bf16 MXU operands, f32 accumulation.
    h = jnp.dot(x, w1_ref[...], preferred_element_type=jnp.float32)
    h = jnp.maximum(h * s1 + b1_ref[...], 0.0)

    # TODO(synk): nn.Dropout is identity in eval mode; training-mode dropout
    # (pltpu.prng_random_bits mask + 1/(1-p) scaling) intentionally omitted.

    # logits = (h @ v2^T) * s2 + b2
    out = jnp.dot(h.astype(jnp.bfloat16), w2_ref[...],
                  preferred_element_type=jnp.float32)
    o_ref[...] = (out * s2 + b2_ref[...]).astype(o_ref.dtype)


# ----------------------------- packing --------------------------------------


def pack_params(params):
    """One-time packing: pre-transpose, pad hid/out dims to lane-dense x128,
    cast matmul operands to bf16, fold weight_norm into f32 SMEM scalars.
    The contraction dim of the first matmul (in_dim) is intentionally NOT padded."""
    v1, v2 = params["v1"], params["v2"]
    hid_dim, in_dim = v1.shape
    out_dim = v2.shape[0]
    hid_p = _round_up(hid_dim, LANE)
    out_p = _round_up(out_dim, LANE)

    # weight_norm(dim=None): w = g * v / ||v||_F  -> scalar scale, kept in f32.
    s1 = (params["g1"] / jnp.linalg.norm(v1)).astype(jnp.float32)
    s2 = (params["g2"] / jnp.linalg.norm(v2)).astype(jnp.float32)
    scales = jnp.stack([s1, s2])

    w1_t = jnp.pad(v1.T.astype(jnp.bfloat16),                     # (in_dim, hid_p)
                   ((0, 0), (0, hid_p - hid_dim)))
    w2_t = jnp.pad(v2.T.astype(jnp.bfloat16),                     # (hid_p, out_p)
                   ((0, hid_p - hid_dim), (0, out_p - out_dim)))
    # Padded bias entries are 0 so relu(0) = 0 in padded hidden columns (inert).
    b1 = jnp.pad(params["b1"].astype(jnp.float32),
                 (0, hid_p - hid_dim)).reshape(1, hid_p)
    b2 = jnp.pad(params["b2"].astype(jnp.float32),
                 (0, out_p - out_dim)).reshape(1, out_p)

    return {"scales": scales, "w1_t": w1_t, "b1": b1, "w2_t": w2_t, "b2": b2,
            "in_dim": in_dim, "hid_dim": hid_dim, "out_dim": out_dim}


# ----------------------------- wrapper --------------------------------------


def _tile_vmem_bytes(tb, in_dim, hid_p, out_p, w_bytes, weight_bufs):
    """Rough VMEM footprint (bytes) for one batch-tile choice."""
    in_l = _round_up(in_dim, LANE)
    x_buf = 2 * tb * in_l * 4            # f32 x tile, double-buffered (lane-padded)
    o_buf = 2 * tb * out_p * 4           # f32 out tile, double-buffered
    h_buf = tb * hid_p * (4 + 2)         # f32 accumulator + bf16 copy of h
    return x_buf + o_buf + h_buf + weight_bufs * w_bytes


def simple_classifier(x, packed, tb=512, single_buffer_weights=True):
    """x: [B, in_dim] float32.  packed: output of pack_params()."""
    B, in_dim = x.shape
    assert in_dim == packed["in_dim"]
    hid_p = packed["w1_t"].shape[1]
    out_p = packed["w2_t"].shape[1]
    out_dim = packed["out_dim"]

    w_bytes = ((packed["w1_t"].size + packed["w2_t"].size) * 2
               + (packed["b1"].size + packed["b2"].size) * 4)
    weight_bufs = 1 if single_buffer_weights else 2

    # Per-generation VMEM budget (v5e/v6e: 128 MiB, v7x: 64 MiB), with headroom
    # for compiler-internal scratch.
    try:
        vmem_phys = pltpu.get_tpu_info().vmem_capacity_bytes
    except Exception:
        vmem_phys = 64 * 1024 * 1024     # conservative (v7x-sized) fallback
    vmem_cap = int(vmem_phys * 0.80)

    # Batch tile: multiple of 16 (bf16 sublane packing), ideally >=256 to fill
    # the v6e/v7x 256-row MXU; capped by the batch and by the VMEM budget.
    tb = max(BF16_SUBLANE, (tb // BF16_SUBLANE) * BF16_SUBLANE)
    tb = min(tb, _round_up(B, BF16_SUBLANE))
    while tb > BF16_SUBLANE and _tile_vmem_bytes(
            tb, in_dim, hid_p, out_p, w_bytes, weight_bufs) > vmem_cap:
        tb = max(BF16_SUBLANE, (tb // 2 // BF16_SUBLANE) * BF16_SUBLANE)

    # Give the "parallel" batch axis at least 2 grid steps so v7x's two
    # TensorCores both get work (no effect on v5e/v6e: 1 TC).
    if pl.cdiv(B, tb) < 2 and _round_up(B, BF16_SUBLANE) >= 2 * BF16_SUBLANE:
        tb = max(BF16_SUBLANE,
                 (_round_up(B, BF16_SUBLANE) // 2 // BF16_SUBLANE) * BF16_SUBLANE)

    grid = (pl.cdiv(B, tb),)

    need = _tile_vmem_bytes(tb, in_dim, hid_p, out_p, w_bytes, weight_bufs)
    vmem_limit = int(min(max(2 * need, 32 * 1024 * 1024), vmem_cap))

    flops = 2 * B * (in_dim * hid_p + hid_p * out_p)
    bytes_accessed = int(x.size * 4 + w_bytes + 8 + B * out_p * 4)
    cost = pl.CostEstimate(flops=flops, transcendentals=0,
                           bytes_accessed=bytes_accessed)

    def run(single_buffer):
        # Grid-invariant (resident) operands: single-buffer when supported.
        pm = {"pipeline_mode": pl.Buffered(1)} if single_buffer else {}
        in_specs = [
            pl.BlockSpec(memory_space=pltpu.MemorySpace.SMEM),        # scales (2,)
            pl.BlockSpec((tb, in_dim), lambda i: (i, 0)),             # x tile (unpadded K)
            pl.BlockSpec((in_dim, hid_p), lambda i: (0, 0), **pm),    # W1^T (resident)
            pl.BlockSpec((1, hid_p), lambda i: (0, 0), **pm),         # b1
            pl.BlockSpec((hid_p, out_p), lambda i: (0, 0), **pm),     # W2^T (resident)
            pl.BlockSpec((1, out_p), lambda i: (0, 0), **pm),         # b2
        ]
        return pl.pallas_call(
            classifier_kernel,
            out_shape=jax.ShapeDtypeStruct((B, out_p), jnp.float32),
            grid_spec=pltpu.PrefetchScalarGridSpec(
                num_scalar_prefetch=0,
                grid=grid,
                in_specs=in_specs,
                out_specs=pl.BlockSpec((tb, out_p), lambda i: (i, 0)),
            ),
            compiler_params=pltpu.CompilerParams(
                dimension_semantics=("parallel",),   # shard batch tiles across TCs
                vmem_limit_bytes=vmem_limit,
            ),
            cost_estimate=cost,
        )(packed["scales"], x, packed["w1_t"], packed["b1"],
          packed["w2_t"], packed["b2"])

    if single_buffer_weights:
        try:
            out = run(True)
        except Exception:
            # Older jax without BlockSpec pipeline_mode support: default buffering.
            out = run(False)
    else:
        out = run(False)

    return out[:, :out_dim].astype(x.dtype)


# ----------------------------- references / demo ----------------------------


def init_params(key, in_dim, hid_dim, out_dim):
    k1, k2, k3, k4 = jax.random.split(key, 4)
    v1 = jax.random.normal(k1, (hid_dim, in_dim), jnp.float32) * 0.05
    b1 = jax.random.normal(k2, (hid_dim,), jnp.float32) * 0.01
    v2 = jax.random.normal(k3, (out_dim, hid_dim), jnp.float32) * 0.05
    b2 = jax.random.normal(k4, (out_dim,), jnp.float32) * 0.01
    # weight_norm init sets g = ||v|| so the effective weight equals v initially.
    g1 = jnp.linalg.norm(v1)
    g2 = jnp.linalg.norm(v2)
    return {"v1": v1, "g1": g1, "b1": b1, "v2": v2, "g2": g2, "b2": b2}


def reference_forward_f32(x, params):
    w1 = params["g1"] * params["v1"] / jnp.linalg.norm(params["v1"])
    w2 = params["g2"] * params["v2"] / jnp.linalg.norm(params["v2"])
    h = jnp.maximum(x @ w1.T + params["b1"], 0.0)
    return h @ w2.T + params["b2"]


def reference_forward_bf16(x, params):
    # Same bf16-operand / f32-accumulate recipe as the kernel.
    s1 = params["g1"] / jnp.linalg.norm(params["v1"])
    s2 = params["g2"] / jnp.linalg.norm(params["v2"])
    h = jnp.dot(x.astype(jnp.bfloat16), params["v1"].T.astype(jnp.bfloat16),
                preferred_element_type=jnp.float32) * s1 + params["b1"]
    h = jnp.maximum(h, 0.0)
    return jnp.dot(h.astype(jnp.bfloat16), params["v2"].T.astype(jnp.bfloat16),
                   preferred_element_type=jnp.float32) * s2 + params["b2"]


if __name__ == "__main__":
    key = jax.random.PRNGKey(0)
    kx, kp = jax.random.split(key)

    B, in_dim, hid_dim, out_dim = 32, 32, 64, 16
    x = jax.random.normal(kx, (B, in_dim), jnp.float32)
    params = init_params(kp, in_dim, hid_dim, out_dim)

    packed = pack_params(params)          # one-time layout / dtype packing
    out = simple_classifier(x, packed)    # default tb -> 2 parallel grid steps here
    out = jax.block_until_ready(out)

    assert out.shape == (B, out_dim)
    # Tight check vs. a bf16-operand reference (same math as the kernel).
    ref_bf16 = reference_forward_bf16(x, params)
    assert jnp.allclose(out, ref_bf16, atol=1e-4, rtol=1e-4), "mismatch vs bf16 ref"
    # Loose check vs. the full-f32 PyTorch-equivalent forward.
    ref_f32 = reference_forward_f32(x, params)
    assert jnp.allclose(out, ref_f32, atol=2e-2, rtol=2e-2), "mismatch vs f32 ref"

    print("KERNEL_OK")
</pallas_src>

<mosaic_0001>
module attributes {stable_mosaic.version = 11 : i64} {
  func.func @classifier_kernel(%arg0: i32, %arg1: memref<2xf32, #tpu.memory_space<smem>>, %arg2: memref<16x32xf32, #tpu.memory_space<vmem>>, %arg3: memref<32x128xbf16, #tpu.memory_space<vmem>>, %arg4: memref<1x128xf32, #tpu.memory_space<vmem>>, %arg5: memref<128x128xbf16, #tpu.memory_space<vmem>>, %arg6: memref<1x128xf32, #tpu.memory_space<vmem>>, %arg7: memref<16x128xf32, #tpu.memory_space<vmem>>) attributes {dimension_semantics = [#tpu.dimension_semantics<parallel>], iteration_bounds = array<i64: 2>, scalar_prefetch = 0 : i64, scratch_operands = 0 : i64, tpu.core_type = #tpu.core_type<tc>, window_params = [{transform_indices = @transform_0, window_bounds = array<i64: 2>}, {transform_indices = @transform_1, window_bounds = array<i64: 16, 32>}, {pipeline_mode = #tpu.pipeline_mode<synchronous>, transform_indices = @transform_2, window_bounds = array<i64: 32, 128>}, {pipeline_mode = #tpu.pipeline_mode<synchronous>, transform_indices = @transform_3, window_bounds = array<i64: 1, 128>}, {pipeline_mode = #tpu.pipeline_mode<synchronous>, transform_indices = @transform_4, window_bounds = array<i64: 128, 128>}, {pipeline_mode = #tpu.pipeline_mode<synchronous>, transform_indices = @transform_5, window_bounds = array<i64: 1, 128>}, {transform_indices = @transform_6, window_bounds = array<i64: 16, 128>}]} {
    %c0 = arith.constant 0 : index
    %0 = memref.load %arg1[%c0] : memref<2xf32, #tpu.memory_space<smem>>
    %c1 = arith.constant 1 : index
    %1 = memref.load %arg1[%c1] : memref<2xf32, #tpu.memory_space<smem>>
    %c0_0 = arith.constant 0 : index
    %c0_1 = arith.constant 0 : index
    %2 = vector.load %arg2[%c0_0, %c0_1] : memref<16x32xf32, #tpu.memory_space<vmem>>, vector<16x32xf32>
    %3 = arith.truncf %2 : vector<16x32xf32> to vector<16x32xbf16>
    %c0_2 = arith.constant 0 : index
    %c0_3 = arith.constant 0 : index
    %4 = vector.load %arg3[%c0_2, %c0_3] : memref<32x128xbf16, #tpu.memory_space<vmem>>, vector<32x128xbf16>
    %cst = arith.constant dense<0.000000e+00> : vector<16x128xf32>
    %5 = tpu.matmul %3, %4, %cst {dimension_numbers = #tpu.dot_dimension_numbers<[1], [0], [0], [1], [0, 0, 1, 1], [], []>} : vector<16x32xbf16>, vector<32x128xbf16>, vector<16x128xf32> -> vector<16x128xf32>
    %6 = vector.broadcast %0 : f32 to vector<16x128xf32>
    %7 = arith.mulf %5, %6 : vector<16x128xf32>
    %c0_4 = arith.constant 0 : index
    %c0_5 = arith.constant 0 : index
    %8 = vector.load %arg4[%c0_4, %c0_5] : memref<1x128xf32, #tpu.memory_space<vmem>>, vector<1x128xf32>
    %9 = vector.broadcast %8 : vector<1x128xf32> to vector<16x128xf32>
    %10 = arith.addf %7, %9 : vector<16x128xf32>
    %cst_6 = arith.constant 0.000000e+00 : f32
    %11 = vector.broadcast %cst_6 : f32 to vector<16x128xf32>
    %12 = arith.maximumf %10, %11 : vector<16x128xf32>
    %13 = arith.truncf %12 : vector<16x128xf32> to vector<16x128xbf16>
    %c0_7 = arith.constant 0 : index
    %c0_8 = arith.constant 0 : index
    %14 = vector.load %arg5[%c0_7, %c0_8] : memref<128x128xbf16, #tpu.memory_space<vmem>>, vector<128x128xbf16>
    %cst_9 = arith.constant dense<0.000000e+00> : vector<16x128xf32>
    %15 = tpu.matmul %13, %14, %cst_9 {dimension_numbers = #tpu.dot_dimension_numbers<[1], [0], [0], [1], [0, 0, 1, 1], [], []>} : vector<16x128xbf16>, vector<128x128xbf16>, vector<16x128xf32> -> vector<16x128xf32>
    %16 = vector.broadcast %1 : f32 to vector<16x128xf32>
    %17 = arith.mulf %15, %16 : vector<16x128xf32>
    %c0_10 = arith.constant 0 : index
    %c0_11 = arith.constant 0 : index
    %18 = vector.load %arg6[%c0_10, %c0_11] : memref<1x128xf32, #tpu.memory_space<vmem>>, vector<1x128xf32>
    %19 = vector.broadcast %18 : vector<1x128xf32> to vector<16x128xf32>
    %20 = arith.addf %17, %19 : vector<16x128xf32>
    %c0_12 = arith.constant 0 : index
    %c0_13 = arith.constant 0 : index
    %21 = vector.load %arg7[%c0_12, %c0_13] : memref<16x128xf32, #tpu.memory_space<vmem>>, vector<16x128xf32>
    tpu.vector_store %arg7[%c0_12, %c0_13], %20 {strides = array<i32>} : memref<16x128xf32, #tpu.memory_space<vmem>>, vector<16x128xf32>,
    return
  }
  func.func @transform_0(%arg0: i32) -> i32 {
    %c0_i32 = arith.constant 0 : i32
    %c0_i32_0 = arith.constant 0 : i32
    return %c0_i32 : i32
  }
  func.func @transform_1(%arg0: i32) -> (i32, i32) {
    %c0_i32 = arith.constant 0 : i32
    %c0_i32_0 = arith.constant 0 : i32
    return %arg0, %c0_i32 : i32, i32
  }
  func.func @transform_2(%arg0: i32) -> (i32, i32) {
    %c0_i32 = arith.constant 0 : i32
    %c0_i32_0 = arith.constant 0 : i32
    %c0_i32_1 = arith.constant 0 : i32
    return %c0_i32, %c0_i32_0 : i32, i32
  }
  func.func @transform_3(%arg0: i32) -> (i32, i32) {
    %c0_i32 = arith.constant 0 : i32
    %c0_i32_0 = arith.constant 0 : i32
    %c0_i32_1 = arith.constant 0 : i32
    return %c0_i32, %c0_i32_0 : i32, i32
  }
  func.func @transform_4(%arg0: i32) -> (i32, i32) {
    %c0_i32 = arith.constant 0 : i32
    %c0_i32_0 = arith.constant 0 : i32
    %c0_i32_1 = arith.constant 0 : i32
    return %c0_i32, %c0_i32_0 : i32, i32
  }
  func.func @transform_5(%arg0: i32) -> (i32, i32) {
    %c0_i32 = arith.constant 0 : i32
    %c0_i32_0 = arith.constant 0 : i32
    %c0_i32_1 = arith.constant 0 : i32
    return %c0_i32, %c0_i32_0 : i32, i32
  }
  func.func @transform_6(%arg0: i32) -> (i32, i32) {
    %c0_i32 = arith.constant 0 : i32
    %c0_i32_0 = arith.constant 0 : i32
    return %arg0, %c0_i32 : i32, i32
  }
}

module attributes {stable_mosaic.version = 11 : i64} {
  func.func @classifier_kernel(%arg0: i32, %arg1: memref<2xf32, #tpu.memory_space<smem>>, %arg2: memref<16x32xf32, #tpu.memory_space<vmem>>, %arg3: memref<32x128xbf16, #tpu.memory_space<vmem>>, %arg4: memref<1x128xf32, #tpu.memory_space<vmem>>, %arg5: memref<128x128xbf16, #tpu.memory_space<vmem>>, %arg6: memref<1x128xf32, #tpu.memory_space<vmem>>, %arg7: memref<16x128xf32, #tpu.memory_space<vmem>>) attributes {dimension_semantics = [#tpu.dimension_semantics<parallel>], iteration_bounds = array<i64: 2>, scalar_prefetch = 0 : i64, scratch_operands = 0 : i64, tpu.core_type = #tpu.core_type<tc>, window_params = [{transform_indices = @transform_0, window_bounds = array<i64: 2>}, {transform_indices = @transform_1, window_bounds = array<i64: 16, 32>}, {pipeline_mode = #tpu.pipeline_mode<synchronous>, transform_indices = @transform_2, window_bounds = array<i64: 32, 128>}, {pipeline_mode = #tpu.pipeline_mode<synchronous>, transform_indices = @transform_3, window_bounds = array<i64: 1, 128>}, {pipeline_mode = #tpu.pipeline_mode<synchronous>, transform_indices = @transform_4, window_bounds = array<i64: 128, 128>}, {pipeline_mode = #tpu.pipeline_mode<synchronous>, transform_indices = @transform_5, window_bounds = array<i64: 1, 128>}, {transform_indices = @transform_6, window_bounds = array<i64: 16, 128>}]} {
    %c0 = arith.constant 0 : index
    %0 = memref.load %arg1[%c0] : memref<2xf32, #tpu.memory_space<smem>>
    %c1 = arith.constant 1 : index
    %1 = memref.load %arg1[%c1] : memref<2xf32, #tpu.memory_space<smem>>
    %c0_0 = arith.constant 0 : index
    %c0_1 = arith.constant 0 : index
    %2 = vector.load %arg2[%c0_0, %c0_1] : memref<16x32xf32, #tpu.memory_space<vmem>>, vector<16x32xf32>
    %3 = arith.truncf %2 : vector<16x32xf32> to vector<16x32xbf16>
    %c0_2 = arith.constant 0 : index
    %c0_3 = arith.constant 0 : index
    %4 = vector.load %arg3[%c0_2, %c0_3] : memref<32x128xbf16, #tpu.memory_space<vmem>>, vector<32x128xbf16>
    %cst = arith.constant dense<0.000000e+00> : vector<16x128xf32>
    %5 = tpu.matmul %3, %4, %cst {dimension_numbers = #tpu.dot_dimension_numbers<[1], [0], [0], [1], [0, 0, 1, 1], [], []>} : vector<16x32xbf16>, vector<32x128xbf16>, vector<16x128xf32> -> vector<16x128xf32>
    %6 = vector.broadcast %0 : f32 to vector<16x128xf32>
    %7 = arith.mulf %5, %6 : vector<16x128xf32>
    %c0_4 = arith.constant 0 : index
    %c0_5 = arith.constant 0 : index
    %8 = vector.load %arg4[%c0_4, %c0_5] : memref<1x128xf32, #tpu.memory_space<vmem>>, vector<1x128xf32>
    %9 = vector.broadcast %8 : vector<1x128xf32> to vector<16x128xf32>
    %10 = arith.addf %7, %9 : vector<16x128xf32>
    %cst_6 = arith.constant 0.000000e+00 : f32
    %11 = vector.broadcast %cst_6 : f32 to vector<16x128xf32>
    %12 = arith.maximumf %10, %11 : vector<16x128xf32>
    %13 = arith.truncf %12 : vector<16x128xf32> to vector<16x128xbf16>
    %c0_7 = arith.constant 0 : index
    %c0_8 = arith.constant 0 : index
    %14 = vector.load %arg5[%c0_7, %c0_8] : memref<128x128xbf16, #tpu.memory_space<vmem>>, vector<128x128xbf16>
    %cst_9 = arith.constant dense<0.000000e+00> : vector<16x128xf32>
    %15 = tpu.matmul %13, %14, %cst_9 {dimension_numbers = #tpu.dot_dimension_numbers<[1], [0], [0], [1], [0, 0, 1, 1], [], []>} : vector<16x128xbf16>, vector<128x128xbf16>, vector<16x128xf32> -> vector<16x128xf32>
    %16 = vector.broadcast %1 : f32 to vector<16x128xf32>
    %17 = arith.mulf %15, %16 : vector<16x128xf32>
    %c0_10 = arith.constant 0 : index
    %c0_11 = arith.constant 0 : index
    %18 = vector.load %arg6[%c0_10, %c0_11] : memref<1x128xf32, #tpu.memory_space<vmem>>, vector<1x128xf32>
    %19 = vector.broadcast %18 : vector<1x128xf32> to vector<16x128xf32>
    %20 = arith.addf %17, %19 : vector<16x128xf32>
    %c0_12 = arith.constant 0 : index
    %c0_13 = arith.constant 0 : index
    %21 = vector.load %arg7[%c0_12, %c0_13] : memref<16x128xf32, #tpu.memory_space<vmem>>, vector<16x128xf32>
    tpu.vector_store %arg7[%c0_12, %c0_13], %20 {strides = array<i32>} : memref<16x128xf32, #tpu.memory_space<vmem>>, vector<16x128xf32>,
    return
  }
  func.func @transform_0(%arg0: i32) -> i32 {
    %c0_i32 = arith.constant 0 : i32
    %c0_i32_0 = arith.constant 0 : i32
    return %c0_i32 : i32
  }
  func.func @transform_1(%arg0: i32) -> (i32, i32) {
    %c0_i32 = arith.constant 0 : i32
    %c0_i32_0 = arith.constant 0 : i32
    return %arg0, %c0_i32 : i32, i32
  }
  func.func @transform_2(%arg0: i32) -> (i32, i32) {
    %c0_i32 = arith.constant 0 : i32
    %c0_i32_0 = arith.constant 0 : i32
    %c0_i32_1 = arith.constant 0 : i32
    return %c0_i32, %c0_i32_0 : i32, i32
  }
  func.func @transform_3(%arg0: i32) -> (i32, i32) {
    %c0_i32 = arith.constant 0 : i32
    %c0_i32_0 = arith.constant 0 : i32
    %c0_i32_1 = arith.constant 0 : i32
    return %c0_i32, %c0_i32_0 : i32, i32
  }
  func.func @transform_4(%arg0: i32) -> (i32, i32) {
    %c0_i32 = arith.constant 0 : i32
    %c0_i32_0 = arith.constant 0 : i32
    %c0_i32_1 = arith.constant 0 : i32
    return %c0_i32, %c0_i32_0 : i32, i32
  }
  func.func @transform_5(%arg0: i32) -> (i32, i32) {
    %c0_i32 = arith.constant 0 : i32
    %c0_i32_0 = arith.constant 0 : i32
    %c0_i32_1 = arith.constant 0 : i32
    return %c0_i32, %c0_i32_0 : i32, i32
  }
  func.func @transform_6(%arg0: i32) -> (i32, i32) {
    %c0_i32 = arith.constant 0 : i32
    %c0_i32_0 = arith.constant 0 : i32
    return %arg0, %c0_i32 : i32, i32
  }
}

</mosaic_0001>

<bundles_post_ra>
// kernel: tpu_custom_call.1
= control target key start
LH: loop header
LB: loop body
LE: loop exit
PB: predicated region body
PF: predicated region fallthrough
CT: control target
= control target key end

     0   :  { %11 = vsyncpa [#allocation5], 0  ;;  %s1136_s0 = inlined_call_operand.hbm [shape: f32[2], index: 0, kind: input, shape index: {}]   ;;  %s1137_s1 = inlined_call_operand.hbm [shape: f32[32,32], index: 1, kind: input, shape index: {}]   ;;  %s1138_s2 = inlined_call_operand.hbm [shape: bf16[32,128], index: 2, kind: input, shape index: {}]   ;;  %s1139_s3 = inlined_call_operand.vmem [shape: f32[1,128], index: 3, kind: input, shape index: {}]   ;;  %s1140_s4 = inlined_call_operand.hbm [shape: bf16[128,128], index: 4, kind: input, shape index: {}]   ;;  %s1141_s5 = inlined_call_operand.vmem [shape: f32[1,128], index: 5, kind: input, shape index: {}]   ;;  %s1142_s6 = inlined_call_operand.hbm [shape: f32[32,128], index: 6, kind: output, shape index: {}]  }
   0x1   :  { %12 = vsyncpa [#allocation3], 0 }
   0x2   :  { %14 = vsyncpa [#allocation3 + $0x1], 0 }
   0x3   :  { %15 = vsyncpa [#allocation8], 0 }
   0x4   :  { %16 = vsyncpa [#allocation4], 0 }
   0x5   :  { %18 = vsyncpa [#allocation4 + $0x1], 0  ;;  %s966_s21 = smov 0   ;;  %s968_s22 = smov 0  }
   0x6   :  { %s970_s23 = smov 0   ;;  %s972_s24 = smov 0  }
   0x7 LB: > { %s987_s25 = sadd.s32 4294967295, %s920_s24   ;;  %s582_s26 = sadd.s32 4294967294, %s920_s24   ;;  %s920_s24 = sphi %s972_s24, %s1153_s24   ;;  %s916_s23 = sphi %s970_s23, %s1152_s23   ;;  %s912_s22 = sphi %s968_s22, %s1151_s22   ;;  %s908_s21 = sphi %s966_s21, %s1150_s21  }
   0x8   : > { %p65_p0 = scmp.ne.s32.totalorder %s912_s22, %s908_s21  ;;  %p66_p1 = scmp.eq.s32.totalorder %s987_s25, 0 }
   0x9   : > { %p173_p2 = scmp.eq.s32.totalorder %s987_s25, 1  ;;  %p179_p3 = scmp.eq.s32.totalorder %s582_s26, 1 }
   0xa   : > { %p996_p4 = por %p66_p1, %p65_p0  ;;  %p583_p5 = scmp.ge.s32.totalorder %s920_s24, 1 }
   0xb   : > { %p1001_p6 = por %p179_p3, %p65_p0  ;;  %p186_p7 = scmp.lt.s32.totalorder %s920_s24, 3 }
   0xc   : > { %s207_s7 = sshll.u32 %s1138_s2, 4  ;;  %s922_s9 = smov [#allocation7]   ;;  %s208_s7 = int_to_ptr.hbm [resolvable:$true] %s207_s7 }
   0xd   : > { %p1009_p8 = pnand %p583_p5, %p186_p7  ;;  %s209_s10 = sshll.u32 %s922_s9, 4  ;;  %s210_s10 = int_to_ptr.vmem [resolvable:$true] %s209_s10 }
   0xe   : > { %s198_s14 = sshll.u32 %s1136_s0, 4  ;;  %s923_s15 = smov 64   ;;  %s199_s14 = int_to_ptr.hbm [resolvable:$true] %s198_s14 }
   0xf   : > { %p672_p9 = pneg %p1009_p8  ;;  %s924_s16 = smov 4  }
  0x10   : > { %s925_s17 = smov [#allocation2]   ;;  %s224_s20 = sshll.u32 %s1140_s4, 4  ;;  %s225_s20 = int_to_ptr.hbm [resolvable:$true] %s224_s20 }
  0x11   : > { %p1017_p10 = pnand %p672_p9, %p66_p1  ;;  %s926_s26 = smov [#allocation9]  }
  0x12   : > { %s226_s29 = sshll.u32 %s926_s26, 4  ;;  %s1035_s30 = sadd.s32 1, %s920_s24   ;;  %s227_s29 = int_to_ptr.vmem [resolvable:$true] %s226_s29 }
  0x13   : > { %678 = dma.hbm_to_vmem [thread:$0]  (!%p1017_p10), %s208_s7, 256, %s210_s10, [#allocation8], %s923_s15, %s923_s15, %s924_s16  }
  0x14   : > { %675 = dma.hbm_to_smem (!%p1017_p10), %s199_s14, 16, %s925_s17, [#allocation5]  }
  0x15   : > { %681 = dma.hbm_to_vmem [thread:$0]  (!%p1017_p10), %s225_s20, 1024, %s227_s29, [#allocation8], %s923_s15, %s923_s15, %s924_s16  }
  0x16   : > { %s49_s7 = ssub.s32 %s920_s24, %s1035_s30  ;;  %s52_s9 = sadd.s32 1, %s916_s23 }
  0x17   : > { %p50_p12 = scmp.eq.s32.totalorder %s49_s7, 0  ;;  %p59_p13 = scmp.ne.s32.totalorder %s916_s23, %s912_s22 }
  0x18   : > { %p60_p0 = scmp.eq.s32.totalorder %s920_s24, 0  ;;  %p693_p3 = scmp.lt.s32.totalorder %s920_s24, 2 }
  0x19   : > { %s1045_s10 = scalar_select %p50_p12, %s916_s23, %s52_s9  }
  0x1a   : > { %p61_p5 = por %p60_p0, %p59_p13  ;;  %p1049_p7 = por %p173_p2, %p59_p13 }
  0x1b   : > { %s243_s11 = sand.u32 1, %s916_s23   ;;  %s644_s13 = sshll.u32 %s920_s24, 4 }
  0x1c   : > { %s588_s14 = sshll.u32 %s243_s11, 4  ;;  %s252_s17 = scalar_lea.hbm %s1137_s1, %s644_s13 }
  0x1d   : > { %s253_s18 = sshll.u32 %s252_s17, 4  ;;  %s247_s19 = scalar_lea.vmem [#allocation6], %s588_s14  ;;  %s254_s18 = int_to_ptr.hbm [resolvable:$true] %s253_s18 }
  0x1e   : > { %s255_s20 = sshll.u32 %s247_s19, 4  ;;  %p1060_p9 = pnand %p693_p3, %p61_p5  ;;  %s256_s20 = int_to_ptr.vmem [resolvable:$true] %s255_s20 }
  0x1f   : > { %s244_s29 = scalar_lea.sflag [#allocation3], %s243_s11  ;;  %s816_s7 = sshra.s32 %s254_s18, 4  ;;  %s817_s7 = int_to_ptr.hbm [resolvable:$true] %s816_s7 }
  0x20   : > { %s818_s9 = scalar_lea.hbm %s817_s7, 16  ;;  %p820_p10 = pneg %p1060_p9 }
  0x21   : > { %p819_p2 = scmp.ne.s32.totalorder %s817_s7, %s818_s9  ;;  %s823_s15 = scalar_lea.hbm %s1137_s1, 32 }
  0x22   : > { %p824_p0 = scmp.lt.s32.totalorder %s817_s7, %s1137_s1  ;;  %p825_p3 = scmp.lt.s32.totalorder %s823_s15, %s818_s9 }
  0x23   : > { %p821_p12 = pnand %p820_p10, %p819_p2 }
  0x24   : > { %p826_p5 = por %p825_p3, %p824_p0 }
  0x25   : > { %p822_p13 = pneg %p821_p12 }
  0x27   : > { %p827_p11 = pnand %p826_p5, %p822_p13 }
  0x29   : > { %830 = shalt.err (!%p827_p11)
}
  0x2a   : > { %s927_s11 = smov 128   ;;  %s928_s19 = smov 8  }
  0x2b   : > { %685 = dma.hbm_to_vmem [thread:$0]  (!%p1060_p9), %s254_s18, 256, %s256_s20, %s244_s29, %s927_s11, %s927_s11, %s928_s19  }
  0x2c   : > { %267 = sbr.rel (%p1009_p8) target bundleno = 350 (0x15e), region = 44 }
  0x31   : > { %891 = dma.done.wait (%p66_p1), [#allocation5], 16  }
  0x32   : > { %893 = vsyncadd (%p66_p1), [#allocation5], 4294967280  ;;  %s1081_s7 = sand.u32 1, %s912_s22  }
  0x33   : > { %s593_s9 = sshll.u32 %s1081_s7, 4  ;;  %s275_s13 = scalar_lea.sflag [#allocation3], %s1081_s7 }
  0x34   : > { %s278_s18 = scalar_lea.vmem [#allocation6], %s593_s9 }
  0x35   : > { %895 = dma.done.wait (%p996_p4), %s275_s13, 256  }
  0x36   : > { %897 = vsyncadd (%p996_p4), %s275_s13, 4294967040 }
  0x37   : > { %899 = dma.done.wait (%p66_p1), [#allocation8], 1280  }
  0x38   : > { %901 = vsyncadd (%p66_p1), [#allocation8], 4294966016 }
  0x39   : > { %294 = sfence }
  0x3a   : > { %v646_v0 = vld [vmem:[#allocation7 + $0x8] sm:$0xff]  ;;  %v645_v1 = vld [vmem:[#allocation7] sm:$0xff]  ;;  %vm343_vm0 = vcmask 261120   ;;  %v652_v7 = vld [vmem:[#allocation9 + $0x28] sm:$0xff]  ;;  %s322_s27 = sld [smem:[#allocation2]]  ;;  %s655_s15 = sshll.u32 %s987_s25, 4 }
  0x3b   : > { %v654_v2 = vld [vmem:[#allocation9 + $0x38] sm:$0xff]  ;;  %353 = vmatpush.bf16.msra.mxu0 %v646_v0  ;;  %v324_v3 = vld [vmem:[%s278_s18] sm:$0xff]  ;;  %v648_v11 = vld [vmem:[#allocation9 + $0x8] sm:$0xff]  ;;  %s597_s26 = sld [smem:[#allocation2 + $0x1]]  ;;  %s474_s11 = scalar_lea.hbm %s1142_s6, %s655_s15 }
  0x3c   : > { %v325_v4 = vld [vmem:[%s278_s18 + $0x8] sm:$0xff]  ;;  %437 = vmatpush.bf16.msra.mxu1 %v654_v2  ;;  %v653_v5 = vld [vmem:[#allocation9 + $0x30] sm:$0xff]  ;;  %v651_v8 = vld [vmem:[#allocation9 + $0x20] sm:$0xff]  ;;  %s318_s19 = scalar_lea.vmem [#allocation10], %s593_s9  ;;  %s477_s18 = sshll.u32 %s474_s11, 4  ;;  %s478_s18 = int_to_ptr.hbm [resolvable:$true] %s477_s18 }
  0x3d   : > { %v326_v6 = vpack.c.bf16 %v325_v4, %v324_v3  ;;  %v650_v9 = vld [vmem:[#allocation9 + $0x18] sm:$0xff]  ;;  %v649_v10 = vld [vmem:[#allocation9 + $0x10] sm:$0xff]  ;;  %v647_v12 = vld [vmem:[#allocation9] sm:$0xff]  ;;  %s475_s13 = sshll.u32 %s318_s19, 4  ;;  %s860_s8 = sshra.s32 %s478_s18, 4  ;;  %s476_s13 = int_to_ptr.vmem [resolvable:$true] %s475_s13  ;;  %s861_s8 = int_to_ptr.hbm [resolvable:$true] %s860_s8 }
  0x3e   : > { %v739_v16 = vld [vmem:[%s1139_s3] ss:$0 sm:$0xff]  ;;  %s862_s25 = scalar_lea.hbm %s861_s8, 16  ;;  %s866_s9 = scalar_lea.hbm %s1142_s6, 32 }
  0x3f   : > { %354 = vmatpush.bf16.msra.mxu0 %v645_v1  ;;  %v740_v25 = vld [vmem:[%s1141_s5] ss:$0 sm:$0xff]  ;;  %p863_p1 = scmp.ne.s32.totalorder %s861_s8, %s862_s25  ;;  %p867_p11 = scmp.lt.s32.totalorder %s861_s8, %s1142_s6 }
  0x40   : > { %438 = vmatpush.bf16.msra.mxu1 %v653_v5  ;;  %v361_v14 = vstv %s322_s27  ;;  %s463_s27 = scalar_lea.sflag [#allocation4], %s1081_s7  ;;  %p868_p9 = scmp.lt.s32.totalorder %s866_s9, %s862_s25 }
  0x41   : > { %v451_v24 = vstv %s597_s26  ;;  %p864_p4 = pnand %p863_p1, %p1049_p7 }
  0x42   : > { %606 = vmatmul.msk.bf16.vlgmr.msra.gmra.mxu0 %vm343_vm0, %v326_v6  ;;  %p869_p2 = por %p868_p9, %p867_p11 }
  0x43   : > { %p865_p8 = pneg %p864_p4 }
  0x44   : > { %439 = vmatpush.bf16.msra.mxu1 %v652_v7 }
  0x45   : > { %p870_p10 = pnand %p869_p2, %p865_p8 }
  0x48   : > { %440 = vmatpush.bf16.msra.mxu1 %v651_v8 }
  0x4c   : > { %441 = vmatpush.bf16.msra.mxu1 %v650_v9 }
  0x50   : > { %442 = vmatpush.bf16.msra.mxu1 %v649_v10 }
  0x54   : > { %443 = vmatpush.bf16.msra.mxu1 %v648_v11 }
  0x58   : > { %444 = vmatpush.bf16.msra.mxu1 %v647_v12 }
  0xbf   : > { %v356_v13 = vpop.f32.mrf.mxu0 }
  0xc0   : > { %v362_v15 = vmul.f32 %v361_v14, %v356_v13 }
  0xc2   : > { %v368_v18 = vadd.f32 %v739_v16, %v362_v15 }
  0xc4   : > { %v370_v21 = vmax.f32 %v368_v18, 0.0 }
  0xc7   : > { %v358_v17 = vpop.f32.mrf.mxu0 }
  0xc8   : > { %v363_v19 = vmul.f32 %v361_v14, %v358_v17 }
  0xca   : > { %v369_v20 = vadd.f32 %v739_v16, %v363_v19 }
  0xcc   : > { %v371_v22 = vmax.f32 %v369_v20, 0.0 }
  0xce   : > { %v372_v23 = vpack.c.bf16 %v371_v22, %v370_v21 }
  0xd0   : > { %445 = vmatmul.bf16.vlgmr.msra.gmra.mxu1 %v372_v23 }
 0x14d   : > { %v446_v26 = vpop.f32.mrf.mxu1 }
 0x14e   : > { %v452_v27 = vmul.f32 %v451_v24, %v446_v26 }
 0x150   : > { %v458_v28 = vadd.f32 %v740_v25, %v452_v27 }
 0x152   : > { %460 = vst [vmem:[%s318_s19] sm:$0xff] %v458_v28 }
 0x155   : > { %v448_v29 = vpop.f32.mrf.mxu1 }
 0x156   : > { %v453_v30 = vmul.f32 %v451_v24, %v448_v29 }
 0x158   : > { %v459_v31 = vadd.f32 %v740_v25, %v453_v30 }
 0x15a   : > { %461 = vst [vmem:[%s318_s19 + $0x8] sm:$0xff] %v459_v31 }
 0x15b   : > { %873 = shalt.err (!%p870_p10)
}
 0x15c   : > { %s929_s7 = smov 128   ;;  %s930_s15 = smov 8  }
 0x15d   : > { %670 = dma.vmem_to_hbm [thread:$0]  (%p1049_p7), %s476_s13, 256, %s478_s18, %s463_s27, %s929_s7, %s929_s7, %s930_s15  }
 0x15e PF: > { %s492_s16 = sand.u32 1, %s908_s21   ;;  %p1149_p12 = scmp.ge.s32.totalorder %s920_s24, 2 }
 0x15f   : > { %s493_s17 = scalar_lea.sflag [#allocation4], %s492_s16 }
 0x160   : > { %p687_p13 = pnand %p1149_p12, %p1001_p6 }
 0x162   : > { %p688_p0 = pneg %p687_p13 }
 0x164   : > { %903 = dma.done.wait (%p688_p0), %s493_s17, 256  }
 0x165   : > { %905 = vsyncadd (%p688_p0), %s493_s17, 4294967040  ;;  %p21_p3 = scmp.ge.s32.totalorder %s1035_s30, 4   ;;  %s1150_s21 = smov %s912_s22 }
 0x166   : > { %s1151_s22 = smov %s916_s23  ;;  %s1152_s23 = smov %s1045_s10 }
 0x167   : > { %s1153_s24 = smov %s1035_s30  ;;  %23 = sbr.rel (!%p21_p3) target bundleno = 7 (0x7), region = 102 }
 0x16c   :  { %499 = vsyncpa [#allocation3], 1 }
 0x16d   :  { %501 = vsyncpa [#allocation3 + $0x1], 1 }
 0x16e   :  { %502 = vsyncpa [#allocation8], 1 }
 0x16f   :  { %503 = vsyncpa [#allocation4], 1 }
 0x170   :  { %505 = vsyncpa [#allocation4 + $0x1], 1 }
 0x171   :  { %506 = vsyncpa [#allocation5], 1 }
 0x172   :  { %508 = vsyncpa [#allocation5 + $0x1], 1 }

// kernel: tpu_custom_call.1
= control target key start
LH: loop header
LB: loop body
LE: loop exit
PB: predicated region body
PF: predicated region fallthrough
CT: control target
= control target key end

     0   :  { %11 = vsyncpa [#allocation5], 0  ;;  %s1136_s0 = inlined_call_operand.hbm [shape: f32[2], index: 0, kind: input, shape index: {}]   ;;  %s1137_s1 = inlined_call_operand.hbm [shape: f32[32,32], index: 1, kind: input, shape index: {}]   ;;  %s1138_s2 = inlined_call_operand.hbm [shape: bf16[32,128], index: 2, kind: input, shape index: {}]   ;;  %s1139_s3 = inlined_call_operand.vmem [shape: f32[1,128], index: 3, kind: input, shape index: {}]   ;;  %s1140_s4 = inlined_call_operand.hbm [shape: bf16[128,128], index: 4, kind: input, shape index: {}]   ;;  %s1141_s5 = inlined_call_operand.vmem [shape: f32[1,128], index: 5, kind: input, shape index: {}]   ;;  %s1142_s6 = inlined_call_operand.hbm [shape: f32[32,128], index: 6, kind: output, shape index: {}]  }
   0x1   :  { %12 = vsyncpa [#allocation3], 0 }
   0x2   :  { %14 = vsyncpa [#allocation3 + $0x1], 0 }
   0x3   :  { %15 = vsyncpa [#allocation8], 0 }
   0x4   :  { %16 = vsyncpa [#allocation4], 0 }
   0x5   :  { %18 = vsyncpa [#allocation4 + $0x1], 0  ;;  %s966_s21 = smov 0   ;;  %s968_s22 = smov 0  }
   0x6   :  { %s970_s23 = smov 0   ;;  %s972_s24 = smov 0  }
   0x7 LB: > { %s987_s25 = sadd.s32 4294967295, %s920_s24   ;;  %s582_s26 = sadd.s32 4294967294, %s920_s24   ;;  %s920_s24 = sphi %s972_s24, %s1153_s24   ;;  %s916_s23 = sphi %s970_s23, %s1152_s23   ;;  %s912_s22 = sphi %s968_s22, %s1151_s22   ;;  %s908_s21 = sphi %s966_s21, %s1150_s21  }
   0x8   : > { %p65_p0 = scmp.ne.s32.totalorder %s912_s22, %s908_s21  ;;  %p66_p1 = scmp.eq.s32.totalorder %s987_s25, 0 }
   0x9   : > { %p173_p2 = scmp.eq.s32.totalorder %s987_s25, 1  ;;  %p179_p3 = scmp.eq.s32.totalorder %s582_s26, 1 }
   0xa   : > { %p996_p4 = por %p66_p1, %p65_p0  ;;  %p583_p5 = scmp.ge.s32.totalorder %s920_s24, 1 }
   0xb   : > { %p1001_p6 = por %p179_p3, %p65_p0  ;;  %p186_p7 = scmp.lt.s32.totalorder %s920_s24, 3 }
   0xc   : > { %s207_s7 = sshll.u32 %s1138_s2, 4  ;;  %s922_s9 = smov [#allocation7]   ;;  %s208_s7 = int_to_ptr.hbm [resolvable:$true] %s207_s7 }
   0xd   : > { %p1009_p8 = pnand %p583_p5, %p186_p7  ;;  %s209_s10 = sshll.u32 %s922_s9, 4  ;;  %s210_s10 = int_to_ptr.vmem [resolvable:$true] %s209_s10 }
   0xe   : > { %s198_s14 = sshll.u32 %s1136_s0, 4  ;;  %s923_s15 = smov 64   ;;  %s199_s14 = int_to_ptr.hbm [resolvable:$true] %s198_s14 }
   0xf   : > { %p672_p9 = pneg %p1009_p8  ;;  %s924_s16 = smov 4  }
  0x10   : > { %s925_s17 = smov [#allocation2]   ;;  %s224_s20 = sshll.u32 %s1140_s4, 4  ;;  %s225_s20 = int_to_ptr.hbm [resolvable:$true] %s224_s20 }
  0x11   : > { %p1017_p10 = pnand %p672_p9, %p66_p1  ;;  %s926_s26 = smov [#allocation9]  }
  0x12   : > { %s226_s29 = sshll.u32 %s926_s26, 4  ;;  %s1035_s30 = sadd.s32 1, %s920_s24   ;;  %s227_s29 = int_to_ptr.vmem [resolvable:$true] %s226_s29 }
  0x13   : > { %678 = dma.hbm_to_vmem [thread:$0]  (!%p1017_p10), %s208_s7, 256, %s210_s10, [#allocation8], %s923_s15, %s923_s15, %s924_s16  }
  0x14   : > { %675 = dma.hbm_to_smem (!%p1017_p10), %s199_s14, 16, %s925_s17, [#allocation5]  }
  0x15   : > { %681 = dma.hbm_to_vmem [thread:$0]  (!%p1017_p10), %s225_s20, 1024, %s227_s29, [#allocation8], %s923_s15, %s923_s15, %s924_s16  }
  0x16   : > { %s49_s7 = ssub.s32 %s920_s24, %s1035_s30  ;;  %s52_s9 = sadd.s32 1, %s916_s23 }
  0x17   : > { %p50_p12 = scmp.eq.s32.totalorder %s49_s7, 0  ;;  %p59_p13 = scmp.ne.s32.totalorder %s916_s23, %s912_s22 }
  0x18   : > { %p60_p0 = scmp.eq.s32.totalorder %s920_s24, 0  ;;  %p693_p3 = scmp.lt.s32.totalorder %s920_s24, 2 }
  0x19   : > { %s1045_s10 = scalar_select %p50_p12, %s916_s23, %s52_s9  }
  0x1a   : > { %p61_p5 = por %p60_p0, %p59_p13  ;;  %p1049_p7 = por %p173_p2, %p59_p13 }
  0x1b   : > { %s243_s11 = sand.u32 1, %s916_s23   ;;  %s644_s13 = sshll.u32 %s920_s24, 4 }
  0x1c   : > { %s588_s14 = sshll.u32 %s243_s11, 4  ;;  %s252_s17 = scalar_lea.hbm %s1137_s1, %s644_s13 }
  0x1d   : > { %s253_s18 = sshll.u32 %s252_s17, 4  ;;  %s247_s19 = scalar_lea.vmem [#allocation6], %s588_s14  ;;  %s254_s18 = int_to_ptr.hbm [resolvable:$true] %s253_s18 }
  0x1e   : > { %s255_s20 = sshll.u32 %s247_s19, 4  ;;  %p1060_p9 = pnand %p693_p3, %p61_p5  ;;  %s256_s20 = int_to_ptr.vmem [resolvable:$true] %s255_s20 }
  0x1f   : > { %s244_s29 = scalar_lea.sflag [#allocation3], %s243_s11  ;;  %s816_s7 = sshra.s32 %s254_s18, 4  ;;  %s817_s7 = int_to_ptr.hbm [resolvable:$true] %s816_s7 }
  0x20   : > { %s818_s9 = scalar_lea.hbm %s817_s7, 16  ;;  %p820_p10 = pneg %p1060_p9 }
  0x21   : > { %p819_p2 = scmp.ne.s32.totalorder %s817_s7, %s818_s9  ;;  %s823_s15 = scalar_lea.hbm %s1137_s1, 32 }
  0x22   : > { %p824_p0 = scmp.lt.s32.totalorder %s817_s7, %s1137_s1  ;;  %p825_p3 = scmp.lt.s32.totalorder %s823_s15, %s818_s9 }
  0x23   : > { %p821_p12 = pnand %p820_p10, %p819_p2 }
  0x24   : > { %p826_p5 = por %p825_p3, %p824_p0 }
  0x25   : > { %p822_p13 = pneg %p821_p12 }
  0x27   : > { %p827_p11 = pnand %p826_p5, %p822_p13 }
  0x29   : > { %830 = shalt.err (!%p827_p11)
}
  0x2a   : > { %s927_s11 = smov 128   ;;  %s928_s19 = smov 8  }
  0x2b   : > { %685 = dma.hbm_to_vmem [thread:$0]  (!%p1060_p9), %s254_s18, 256, %s256_s20, %s244_s29, %s927_s11, %s927_s11, %s928_s19  }
  0x2c   : > { %267 = sbr.rel (%p1009_p8) target bundleno = 350 (0x15e), region = 44 }
  0x31   : > { %891 = dma.done.wait (%p66_p1), [#allocation5], 16  }
  0x32   : > { %893 = vsyncadd (%p66_p1), [#allocation5], 4294967280  ;;  %s1081_s7 = sand.u32 1, %s912_s22  }
  0x33   : > { %s593_s9 = sshll.u32 %s1081_s7, 4  ;;  %s275_s13 = scalar_lea.sflag [#allocation3], %s1081_s7 }
  0x34   : > { %s278_s18 = scalar_lea.vmem [#allocation6], %s593_s9 }
  0x35   : > { %895 = dma.done.wait (%p996_p4), %s275_s13, 256  }
  0x36   : > { %897 = vsyncadd (%p996_p4), %s275_s13, 4294967040 }
  0x37   : > { %899 = dma.done.wait (%p66_p1), [#allocation8], 1280  }
  0x38   : > { %901 = vsyncadd (%p66_p1), [#allocation8], 4294966016 }
  0x39   : > { %294 = sfence }
  0x3a   : > { %v646_v0 = vld [vmem:[#allocation7 + $0x8] sm:$0xff]  ;;  %v645_v1 = vld [vmem:[#allocation7] sm:$0xff]  ;;  %vm343_vm0 = vcmask 261120   ;;  %v652_v7 = vld [vmem:[#allocation9 + $0x28] sm:$0xff]  ;;  %s322_s27 = sld [smem:[#allocation2]]  ;;  %s655_s15 = sshll.u32 %s987_s25, 4 }
  0x3b   : > { %v654_v2 = vld [vmem:[#allocation9 + $0x38] sm:$0xff]  ;;  %353 = vmatpush.bf16.msra.mxu0 %v646_v0  ;;  %v324_v3 = vld [vmem:[%s278_s18] sm:$0xff]  ;;  %v648_v11 = vld [vmem:[#allocation9 + $0x8] sm:$0xff]  ;;  %s597_s26 = sld [smem:[#allocation2 + $0x1]]  ;;  %s474_s11 = scalar_lea.hbm %s1142_s6, %s655_s15 }
  0x3c   : > { %v325_v4 = vld [vmem:[%s278_s18 + $0x8] sm:$0xff]  ;;  %437 = vmatpush.bf16.msra.mxu1 %v654_v2  ;;  %v653_v5 = vld [vmem:[#allocation9 + $0x30] sm:$0xff]  ;;  %v651_v8 = vld [vmem:[#allocation9 + $0x20] sm:$0xff]  ;;  %s318_s19 = scalar_lea.vmem [#allocation10], %s593_s9  ;;  %s477_s18 = sshll.u32 %s474_s11, 4  ;;  %s478_s18 = int_to_ptr.hbm [resolvable:$true] %s477_s18 }
  0x3d   : > { %v326_v6 = vpack.c.bf16 %v325_v4, %v324_v3  ;;  %v650_v9 = vld [vmem:[#allocation9 + $0x18] sm:$0xff]  ;;  %v649_v10 = vld [vmem:[#allocation9 + $0x10] sm:$0xff]  ;;  %v647_v12 = vld [vmem:[#allocation9] sm:$0xff]  ;;  %s475_s13 = sshll.u32 %s318_s19, 4  ;;  %s860_s8 = sshra.s32 %s478_s18, 4  ;;  %s476_s13 = int_to_ptr.vmem [resolvable:$true] %s475_s13  ;;  %s861_s8 = int_to_ptr.hbm [resolvable:$true] %s860_s8 }
  0x3e   : > { %v739_v16 = vld [vmem:[%s1139_s3] ss:$0 sm:$0xff]  ;;  %s862_s25 = scalar_lea.hbm %s861_s8, 16  ;;  %s866_s9 = scalar_lea.hbm %s1142_s6, 32 }
  0x3f   : > { %354 = vmatpush.bf16.msra.mxu0 %v645_v1  ;;  %v740_v25 = vld [vmem:[%s1141_s5] ss:$0 sm:$0xff]  ;;  %p863_p1 = scmp.ne.s32.totalorder %s861_s8, %s862_s25  ;;  %p867_p11 = scmp.lt.s32.totalorder %s861_s8, %s1142_s6 }
  0x40   : > { %438 = vmatpush.bf16.msra.mxu1 %v653_v5  ;;  %v361_v14 = vstv %s322_s27  ;;  %s463_s27 = scalar_lea.sflag [#allocation4], %s1081_s7  ;;  %p868_p9 = scmp.lt.s32.totalorder %s866_s9, %s862_s25 }
  0x41   : > { %v451_v24 = vstv %s597_s26  ;;  %p864_p4 = pnand %p863_p1, %p1049_p7 }
  0x42   : > { %606 = vmatmul.msk.bf16.vlgmr.msra.gmra.mxu0 %vm343_vm0, %v326_v6  ;;  %p869_p2 = por %p868_p9, %p867_p11 }
  0x43   : > { %p865_p8 = pneg %p864_p4 }
  0x44   : > { %439 = vmatpush.bf16.msra.mxu1 %v652_v7 }
  0x45   : > { %p870_p10 = pnand %p869_p2, %p865_p8 }
  0x48   : > { %440 = vmatpush.bf16.msra.mxu1 %v651_v8 }
  0x4c   : > { %441 = vmatpush.bf16.msra.mxu1 %v650_v9 }
  0x50   : > { %442 = vmatpush.bf16.msra.mxu1 %v649_v10 }
  0x54   : > { %443 = vmatpush.bf16.msra.mxu1 %v648_v11 }
  0x58   : > { %444 = vmatpush.bf16.msra.mxu1 %v647_v12 }
  0xbf   : > { %v356_v13 = vpop.f32.mrf.mxu0 }
  0xc0   : > { %v362_v15 = vmul.f32 %v361_v14, %v356_v13 }
  0xc2   : > { %v368_v18 = vadd.f32 %v739_v16, %v362_v15 }
  0xc4   : > { %v370_v21 = vmax.f32 %v368_v18, 0.0 }
  0xc7   : > { %v358_v17 = vpop.f32.mrf.mxu0 }
  0xc8   : > { %v363_v19 = vmul.f32 %v361_v14, %v358_v17 }
  0xca   : > { %v369_v20 = vadd.f32 %v739_v16, %v363_v19 }
  0xcc   : > { %v371_v22 = vmax.f32 %v369_v20, 0.0 }
  0xce   : > { %v372_v23 = vpack.c.bf16 %v371_v22, %v370_v21 }
  0xd0   : > { %445 = vmatmul.bf16.vlgmr.msra.gmra.mxu1 %v372_v23 }
 0x14d   : > { %v446_v26 = vpop.f32.mrf.mxu1 }
 0x14e   : > { %v452_v27 = vmul.f32 %v451_v24, %v446_v26 }
 0x150   : > { %v458_v28 = vadd.f32 %v740_v25, %v452_v27 }
 0x152   : > { %460 = vst [vmem:[%s318_s19] sm:$0xff] %v458_v28 }
 0x155   : > { %v448_v29 = vpop.f32.mrf.mxu1 }
 0x156   : > { %v453_v30 = vmul.f32 %v451_v24, %v448_v29 }
 0x158   : > { %v459_v31 = vadd.f32 %v740_v25, %v453_v30 }
 0x15a   : > { %461 = vst [vmem:[%s318_s19 + $0x8] sm:$0xff] %v459_v31 }
 0x15b   : > { %873 = shalt.err (!%p870_p10)
}
 0x15c   : > { %s929_s7 = smov 128   ;;  %s930_s15 = smov 8  }
 0x15d   : > { %670 = dma.vmem_to_hbm [thread:$0]  (%p1049_p7), %s476_s13, 256, %s478_s18, %s463_s27, %s929_s7, %s929_s7, %s930_s15  }
 0x15e PF: > { %s492_s16 = sand.u32 1, %s908_s21   ;;  %p1149_p12 = scmp.ge.s32.totalorder %s920_s24, 2 }
 0x15f   : > { %s493_s17 = scalar_lea.sflag [#allocation4], %s492_s16 }
 0x160   : > { %p687_p13 = pnand %p1149_p12, %p1001_p6 }
 0x162   : > { %p688_p0 = pneg %p687_p13 }
 0x164   : > { %903 = dma.done.wait (%p688_p0), %s493_s17, 256  }
 0x165   : > { %905 = vsyncadd (%p688_p0), %s493_s17, 4294967040  ;;  %p21_p3 = scmp.ge.s32.totalorder %s1035_s30, 4   ;;  %s1150_s21 = smov %s912_s22 }
 0x166   : > { %s1151_s22 = smov %s916_s23  ;;  %s1152_s23 = smov %s1045_s10 }
 0x167   : > { %s1153_s24 = smov %s1035_s30  ;;  %23 = sbr.rel (!%p21_p3) target bundleno = 7 (0x7), region = 102 }
 0x16c   :  { %499 = vsyncpa [#allocation3], 1 }
 0x16d   :  { %501 = vsyncpa [#allocation3 + $0x1], 1 }
 0x16e   :  { %502 = vsyncpa [#allocation8], 1 }
 0x16f   :  { %503 = vsyncpa [#allocation4], 1 }
 0x170   :  { %505 = vsyncpa [#allocation4 + $0x1], 1 }
 0x171   :  { %506 = vsyncpa [#allocation5], 1 }
 0x172   :  { %508 = vsyncpa [#allocation5 + $0x1], 1 }

</bundles_post_ra>
